<compile_context>
chip_gen: v5e
topology: v5e:2x2
jax: 0.10.0
libtpu: 0.0.40
codegen_flags: <defaults>
</compile_context>

<pallas_src>
import functools

import numpy as np
import jax
import jax.numpy as jnp
from jax.experimental import pallas as pl
from jax.experimental.pallas import tpu as pltpu


def _round_up(a, b):
    return (a + b - 1) // b * b


def _round_down(a, b):
    return a // b * b


def ldam_loss_kernel(x_ref, tgt_ref, m_ref, w_ref, num_ref, den_ref,
                     *, s, ignore_index, n_rows, tile_b):
    i = pl.program_id(0)

    x = x_ref[...].astype(jnp.float32)      # [TB, C] logits (upcast in-kernel)
    tgt = tgt_ref[...]                      # [TB, 1]  int32 targets
    m = m_ref[...].astype(jnp.float32)      # [1, C]   per-class margins
    w = w_ref[...].astype(jnp.float32)      # [1, C]   per-class CE weights

    tb, c = x.shape

    # Ragged last tile handled in-kernel (x is NOT padded in HBM).
    row_ids = i * tile_b + jax.lax.broadcasted_iota(jnp.int32, (tb, 1), 0)
    row_valid = row_ids < n_rows                                    # [TB, 1]
    # Zero garbage rows *before* exp/LSE so they cannot produce inf/NaN.
    x = jnp.where(row_valid, x, 0.0)

    # one-hot "scatter_" as a boolean compare (never materialized as f32).
    cls_ids = jax.lax.broadcasted_iota(jnp.int32, (tb, c), 1)
    hit = cls_ids == tgt                                            # [TB, C]

    # onehot[i,c]*batch_m[i] == onehot[i,c]*m_list[c]:
    #   output = where(index, x - batch_m, x) == where(hit, x - m, x)
    xm = x - m                                                      # [TB, C]
    logits = s * jnp.where(hit, xm, x)                              # [TB, C]
    logit_t = s * jnp.sum(jnp.where(hit, xm, 0.0), axis=1, keepdims=True)

    # stable log-sum-exp
    mx = jnp.max(logits, axis=1, keepdims=True)
    lse = mx + jnp.log(jnp.sum(jnp.exp(logits - mx), axis=1, keepdims=True))
    nll = lse - logit_t                                             # [TB, 1]

    # weight[target]
    w_i = jnp.sum(jnp.where(hit, w, 0.0), axis=1, keepdims=True)    # [TB, 1]

    valid = jnp.logical_and(row_valid, tgt != ignore_index).astype(jnp.float32)

    num = jnp.sum(valid * w_i * nll)        # per-tile partial numerator
    den = jnp.sum(valid * w_i)              # per-tile partial denominator

    num_ref[...] = jnp.broadcast_to(num, num_ref.shape)
    den_ref[...] = jnp.broadcast_to(den, den_ref.shape)


def ldam_loss(x, target, m_list, weight, *, s=35.0, ignore_index=2,
              tile_b=None):
    """x: [B, C] (any float dtype), target: [B] int, m_list/weight: [C]."""
    B, C = x.shape
    itemsize = x.dtype.itemsize

    # Per-generation VMEM capacity (v5e/v6e: 128 MiB, v7x: 64 MiB per TC).
    try:
        vmem_cap = int(getattr(pltpu.get_tpu_info(), "vmem_capacity_bytes",
                               64 << 20))
    except Exception:  # pragma: no cover - conservative fallback
        vmem_cap = 64 << 20

    c_pad = _round_up(C, 128)
    b_cap = _round_up(B, 8)
    if tile_b is None:
        tile_b = (4 << 20) // (c_pad * itemsize)   # ~4 MiB of x per buffer
    tile_b = min(max(int(tile_b) // 8 * 8, 8), b_cap)   # multiple of 8, >= 8

    def footprint(tb):
        return (2 * tb * c_pad * itemsize          # double-buffered x tiles
                + 2 * tb * 128 * 4                 # lane-padded int32 targets
                + 5 * tb * c_pad * 4               # f32 [TB,C] intermediates
                + 4 * c_pad * 4 + (1 << 20))       # m/w + slack

    budget = vmem_cap // 2
    while tile_b > 8 and footprint(tile_b) > budget:
        tile_b = max(8, _round_down(tile_b // 2, 8))

    num_tiles = (B + tile_b - 1) // tile_b

    tgt2d = target.astype(jnp.int32).reshape(B, 1)
    m2d = m_list.astype(jnp.float32).reshape(1, C)
    w2d = weight.astype(jnp.float32).reshape(1, C)

    kernel = functools.partial(
        ldam_loss_kernel, s=float(s), ignore_index=int(ignore_index),
        n_rows=int(B), tile_b=int(tile_b))

    vmem_limit = int(min(vmem_cap * 3 // 4,
                         max(32 << 20, 2 * footprint(tile_b))))

    cost = pl.CostEstimate(
        flops=10 * B * C,
        transcendentals=B * C + B,
        bytes_accessed=B * C * itemsize + B * 4 + 2 * C * 4
        + 2 * num_tiles * 128 * 4,
    )

    num_out, den_out = pl.pallas_call(
        kernel,
        grid=(num_tiles,),
        in_specs=[
            pl.BlockSpec((tile_b, C), lambda i: (i, 0)),   # x tile (native dtype)
            pl.BlockSpec((tile_b, 1), lambda i: (i, 0)),   # targets tile
            pl.BlockSpec((1, C), lambda i: (0, 0)),        # m_list (resident)
            pl.BlockSpec((1, C), lambda i: (0, 0)),        # weight (resident)
        ],
        out_specs=[
            pl.BlockSpec((1, 1, 128), lambda i: (i, 0, 0)),  # per-tile num
            pl.BlockSpec((1, 1, 128), lambda i: (i, 0, 0)),  # per-tile den
        ],
        out_shape=[
            jax.ShapeDtypeStruct((num_tiles, 1, 128), jnp.float32),
            jax.ShapeDtypeStruct((num_tiles, 1, 128), jnp.float32),
        ],
        compiler_params=pltpu.CompilerParams(
            dimension_semantics=("parallel",),    # independent tiles (megacore)
            vmem_limit_bytes=vmem_limit,
        ),
        cost_estimate=cost,
    )(x, tgt2d, m2d, w2d)

    # Tiny final reduction + weighted-mean division in the wrapper.
    # (NaN if every target == ignore_index, matching torch's weighted mean.)
    return jnp.sum(num_out[:, 0, 0]) / jnp.sum(den_out[:, 0, 0])


def ldam_loss_ref(x, target, m_list, weight, *, s=35.0, ignore_index=2):
    """Pure-JAX reference matching torch semantics."""
    B, C = x.shape
    onehot = jax.nn.one_hot(target, C, dtype=jnp.float32)
    batch_m = (onehot * m_list[None, :]).sum(axis=1, keepdims=True)
    xf = x.astype(jnp.float32)
    out = jnp.where(onehot > 0, xf - batch_m, xf)
    logits = s * out
    logp = jax.nn.log_softmax(logits, axis=1)
    nll = -(onehot * logp).sum(axis=1)
    w_i = (onehot * weight[None, :]).sum(axis=1)
    valid = (target != ignore_index).astype(jnp.float32)
    return jnp.sum(valid * w_i * nll) / jnp.sum(valid * w_i)


if __name__ == "__main__":
    C = 4
    max_m, s = 0.5, 35.0

    # Deterministic synthetic parameters (the original cls_num_list of zeros
    # would give NaN margins; use positive counts instead).
    cls_num_list = np.array([10.0, 20.0, 30.0, 40.0], dtype=np.float32)
    m_list_np = 1.0 / np.sqrt(np.sqrt(cls_num_list))
    m_list_np = m_list_np * (max_m / np.max(m_list_np))
    weight_np = np.array([1.0, 2.0, 0.5, 1.5], dtype=np.float32)

    m_list = jnp.asarray(m_list_np, dtype=jnp.float32)
    weight = jnp.asarray(weight_np, dtype=jnp.float32)

    key = jax.random.PRNGKey(0)
    k1x, k1t, k2x, k2t = jax.random.split(key, 4)

    # Case 1: small batch, single tile.
    B1 = 8
    x1 = jax.random.normal(k1x, (B1, C), dtype=jnp.float32)
    t1 = jax.random.randint(k1t, (B1,), 0, C, dtype=jnp.int32)
    loss1 = jax.block_until_ready(ldam_loss(x1, t1, m_list, weight, s=s))
    ref1 = ldam_loss_ref(x1, t1, m_list, weight, s=s)
    np.testing.assert_allclose(np.asarray(loss1), np.asarray(ref1),
                               rtol=1e-5, atol=1e-5)

    # Case 2: multi-tile parallel grid + ragged (masked) last tile.
    B2 = 20                       # tile_b=8 -> 3 tiles, last has 4 valid rows
    x2 = jax.random.normal(k2x, (B2, C), dtype=jnp.float32)
    t2 = jax.random.randint(k2t, (B2,), 0, C, dtype=jnp.int32)
    loss2 = jax.block_until_ready(
        ldam_loss(x2, t2, m_list, weight, s=s, tile_b=8))
    ref2 = ldam_loss_ref(x2, t2, m_list, weight, s=s)
    np.testing.assert_allclose(np.asarray(loss2), np.asarray(ref2),
                               rtol=1e-5, atol=1e-5)

    # Case 3: same inputs, auto tile size (single ragged 24-row tile).
    loss3 = jax.block_until_ready(ldam_loss(x2, t2, m_list, weight, s=s))
    np.testing.assert_allclose(np.asarray(loss3), np.asarray(ref2),
                               rtol=1e-5, atol=1e-5)

    print("KERNEL_OK")
</pallas_src>

<mosaic_0001>
module attributes {stable_mosaic.version = 11 : i64} {
  func.func @ldam_loss_kernel(%arg0: i32, %arg1: memref<8x4xf32, #tpu.memory_space<vmem>>, %arg2: memref<8x1xi32, #tpu.memory_space<vmem>>, %arg3: memref<1x4xf32, #tpu.memory_space<vmem>>, %arg4: memref<1x4xf32, #tpu.memory_space<vmem>>, %arg5: memref<1x1x128xf32, #tpu.memory_space<vmem>>, %arg6: memref<1x1x128xf32, #tpu.memory_space<vmem>>) attributes {dimension_semantics = [#tpu.dimension_semantics<parallel>], iteration_bounds = array<i64: 1>, scalar_prefetch = 0 : i64, scratch_operands = 0 : i64, tpu.core_type = #tpu.core_type<tc>, window_params = [{transform_indices = @transform_0, window_bounds = array<i64: 8, 4>}, {transform_indices = @transform_1, window_bounds = array<i64: 8, 1>}, {pipeline_mode = #tpu.pipeline_mode<synchronous>, transform_indices = @transform_2, window_bounds = array<i64: 1, 4>}, {pipeline_mode = #tpu.pipeline_mode<synchronous>, transform_indices = @transform_3, window_bounds = array<i64: 1, 4>}, {transform_indices = @transform_4, window_bounds = array<i64: 1, 1, 128>}, {transform_indices = @transform_5, window_bounds = array<i64: 1, 1, 128>}]} {
    %c0 = arith.constant 0 : index
    %c0_0 = arith.constant 0 : index
    %0 = vector.load %arg1[%c0, %c0_0] : memref<8x4xf32, #tpu.memory_space<vmem>>, vector<8x4xf32>
    %c0_1 = arith.constant 0 : index
    %c0_2 = arith.constant 0 : index
    %1 = vector.load %arg2[%c0_1, %c0_2] : memref<8x1xi32, #tpu.memory_space<vmem>>, vector<8x1xi32>
    %c0_3 = arith.constant 0 : index
    %c0_4 = arith.constant 0 : index
    %2 = vector.load %arg3[%c0_3, %c0_4] : memref<1x4xf32, #tpu.memory_space<vmem>>, vector<1x4xf32>
    %c0_5 = arith.constant 0 : index
    %c0_6 = arith.constant 0 : index
    %3 = vector.load %arg4[%c0_5, %c0_6] : memref<1x4xf32, #tpu.memory_space<vmem>>, vector<1x4xf32>
    %c8_i32 = arith.constant 8 : i32
    %4 = arith.muli %arg0, %c8_i32 : i32
    %5 = tpu.iota {dimensions = array<i32: 0>} : vector<8x1xi32>
    %6 = vector.broadcast %4 : i32 to vector<8x1xi32>
    %7 = arith.addi %6, %5 : vector<8x1xi32>
    %c8_i32_7 = arith.constant 8 : i32
    %8 = vector.broadcast %c8_i32_7 : i32 to vector<8x1xi32>
    %9 = arith.cmpi slt, %7, %8 : vector<8x1xi32>
    %cst = arith.constant 0.000000e+00 : f32
    %10 = vector.shape_cast %9 : vector<8x1xi1> to vector<8x1xi1>
    %11 = vector.broadcast %10 : vector<8x1xi1> to vector<8x4xi1>
    %12 = vector.broadcast %cst : f32 to vector<8x4xf32>
    %13 = arith.select %11, %0, %12 : vector<8x4xi1>, vector<8x4xf32>
    %14 = tpu.iota {dimensions = array<i32: 1>} : vector<8x4xi32>
    %15 = vector.broadcast %1 : vector<8x1xi32> to vector<8x4xi32>
    %16 = arith.cmpi eq, %14, %15 : vector<8x4xi32>
    %17 = vector.broadcast %2 : vector<1x4xf32> to vector<8x4xf32>
    %18 = arith.subf %13, %17 : vector<8x4xf32>
    %19 = arith.select %16, %18, %13 : vector<8x4xi1>, vector<8x4xf32>
    %cst_8 = arith.constant 3.500000e+01 : f32
    %20 = vector.broadcast %cst_8 : f32 to vector<8x4xf32>
    %21 = arith.mulf %20, %19 : vector<8x4xf32>
    %cst_9 = arith.constant 0.000000e+00 : f32
    %22 = vector.broadcast %cst_9 : f32 to vector<8x4xf32>
    %23 = arith.select %16, %18, %22 : vector<8x4xi1>, vector<8x4xf32>
    %cst_10 = arith.constant dense<0.000000e+00> : vector<8xf32>
    %24 = vector.multi_reduction <add>, %23, %cst_10 [1] : vector<8x4xf32> to vector<8xf32>
    %25 = vector.shape_cast %24 : vector<8xf32> to vector<8x1xf32>
    %cst_11 = arith.constant 3.500000e+01 : f32
    %26 = vector.broadcast %cst_11 : f32 to vector<8x1xf32>
    %27 = arith.mulf %26, %25 : vector<8x1xf32>
    %cst_12 = arith.constant dense<0xFF800000> : vector<8xf32>
    %28 = vector.multi_reduction <maximumf>, %21, %cst_12 [1] : vector<8x4xf32> to vector<8xf32>
    %29 = vector.shape_cast %28 : vector<8xf32> to vector<8x1xf32>
    %30 = vector.broadcast %29 : vector<8x1xf32> to vector<8x4xf32>
    %31 = arith.subf %21, %30 : vector<8x4xf32>
    %32 = math.exp %31 : vector<8x4xf32>
    %cst_13 = arith.constant dense<0.000000e+00> : vector<8xf32>
    %33 = vector.multi_reduction <add>, %32, %cst_13 [1] : vector<8x4xf32> to vector<8xf32>
    %34 = vector.shape_cast %33 : vector<8xf32> to vector<8x1xf32>
    %35 = math.log %34 : vector<8x1xf32>
    %36 = arith.addf %29, %35 : vector<8x1xf32>
    %37 = arith.subf %36, %27 : vector<8x1xf32>
    %cst_14 = arith.constant 0.000000e+00 : f32
    %38 = vector.shape_cast %3 : vector<1x4xf32> to vector<1x4xf32>
    %39 = vector.broadcast %38 : vector<1x4xf32> to vector<8x4xf32>
    %40 = vector.broadcast %cst_14 : f32 to vector<8x4xf32>
    %41 = arith.select %16, %39, %40 : vector<8x4xi1>, vector<8x4xf32>
    %cst_15 = arith.constant dense<0.000000e+00> : vector<8xf32>
    %42 = vector.multi_reduction <add>, %41, %cst_15 [1] : vector<8x4xf32> to vector<8xf32>
    %43 = vector.shape_cast %42 : vector<8xf32> to vector<8x1xf32>
    %c2_i32 = arith.constant 2 : i32
    %44 = vector.broadcast %c2_i32 : i32 to vector<8x1xi32>
    %45 = arith.cmpi ne, %1, %44 : vector<8x1xi32>
    %46 = arith.andi %9, %45 : vector<8x1xi1>
    %47 = arith.extui %46 : vector<8x1xi1> to vector<8x1xi32>
    %48 = arith.sitofp %47 : vector<8x1xi32> to vector<8x1xf32>
    %49 = arith.mulf %48, %43 : vector<8x1xf32>
    %50 = arith.mulf %49, %37 : vector<8x1xf32>
    %51 = vector.shape_cast %50 : vector<8x1xf32> to vector<1x8x1xf32>
    %cst_16 = arith.constant dense<0.000000e+00> : vector<1xf32>
    %52 = vector.multi_reduction <add>, %51, %cst_16 [1, 2] : vector<1x8x1xf32> to vector<1xf32>
    %53 = vector.shape_cast %52 : vector<1xf32> to vector<1x1x1xf32>
    %54 = vector.extract %53[0, 0, 0] : f32 from vector<1x1x1xf32>
    %55 = arith.mulf %48, %43 : vector<8x1xf32>
    %56 = vector.shape_cast %55 : vector<8x1xf32> to vector<1x8x1xf32>
    %cst_17 = arith.constant dense<0.000000e+00> : vector<1xf32>
    %57 = vector.multi_reduction <add>, %56, %cst_17 [1, 2] : vector<1x8x1xf32> to vector<1xf32>
    %58 = vector.shape_cast %57 : vector<1xf32> to vector<1x1x1xf32>
    %59 = vector.extract %58[0, 0, 0] : f32 from vector<1x1x1xf32>
    %60 = vector.broadcast %54 : f32 to vector<1x1x128xf32>
    %c0_18 = arith.constant 0 : index
    %c0_19 = arith.constant 0 : index
    %c0_20 = arith.constant 0 : index
    %61 = vector.load %arg5[%c0_18, %c0_19, %c0_20] : memref<1x1x128xf32, #tpu.memory_space<vmem>>, vector<1x1x128xf32>
    tpu.vector_store %arg5[%c0_18, %c0_19, %c0_20], %60 {strides = array<i32>} : memref<1x1x128xf32, #tpu.memory_space<vmem>>, vector<1x1x128xf32>,
    %62 = vector.broadcast %59 : f32 to vector<1x1x128xf32>
    %c0_21 = arith.constant 0 : index
    %c0_22 = arith.constant 0 : index
    %c0_23 = arith.constant 0 : index
    %63 = vector.load %arg6[%c0_21, %c0_22, %c0_23] : memref<1x1x128xf32, #tpu.memory_space<vmem>>, vector<1x1x128xf32>
    tpu.vector_store %arg6[%c0_21, %c0_22, %c0_23], %62 {strides = array<i32>} : memref<1x1x128xf32, #tpu.memory_space<vmem>>, vector<1x1x128xf32>,
    return
  }
  func.func @transform_0(%arg0: i32) -> (i32, i32) {
    %c0_i32 = arith.constant 0 : i32
    %c0_i32_0 = arith.constant 0 : i32
    return %arg0, %c0_i32 : i32, i32
  }
  func.func @transform_1(%arg0: i32) -> (i32, i32) {
    %c0_i32 = arith.constant 0 : i32
    %c0_i32_0 = arith.constant 0 : i32
    return %arg0, %c0_i32 : i32, i32
  }
  func.func @transform_2(%arg0: i32) -> (i32, i32) {
    %c0_i32 = arith.constant 0 : i32
    %c0_i32_0 = arith.constant 0 : i32
    %c0_i32_1 = arith.constant 0 : i32
    return %c0_i32, %c0_i32_0 : i32, i32
  }
  func.func @transform_3(%arg0: i32) -> (i32, i32) {
    %c0_i32 = arith.constant 0 : i32
    %c0_i32_0 = arith.constant 0 : i32
    %c0_i32_1 = arith.constant 0 : i32
    return %c0_i32, %c0_i32_0 : i32, i32
  }
  func.func @transform_4(%arg0: i32) -> (i32, i32, i32) {
    %c0_i32 = arith.constant 0 : i32
    %c0_i32_0 = arith.constant 0 : i32
    %c0_i32_1 = arith.constant 0 : i32
    return %arg0, %c0_i32, %c0_i32_0 : i32, i32, i32
  }
  func.func @transform_5(%arg0: i32) -> (i32, i32, i32) {
    %c0_i32 = arith.constant 0 : i32
    %c0_i32_0 = arith.constant 0 : i32
    %c0_i32_1 = arith.constant 0 : i32
    return %arg0, %c0_i32, %c0_i32_0 : i32, i32, i32
  }
}

</mosaic_0001>

<bundles_post_ra>
// kernel: tpu_custom_call.1
= control target key start
LH: loop header
LB: loop body
LE: loop exit
PB: predicated region body
PF: predicated region fallthrough
CT: control target
= control target key end

     0   :  { %11 = vsyncpa [#allocation3], 0  ;;  %v203_v1 = vmov 0   ;;  %s259_s0 = inlined_call_operand.vmem [shape: f32[8,4], index: 0, kind: input, shape index: {}]   ;;  %s260_s1 = inlined_call_operand.vmem [shape: s32[8,1], index: 1, kind: input, shape index: {}]   ;;  %s261_s2 = inlined_call_operand.vmem [shape: f32[1,4], index: 2, kind: input, shape index: {}]   ;;  %s262_s3 = inlined_call_operand.vmem [shape: f32[1,4], index: 3, kind: input, shape index: {}]   ;;  %s263_s4 = inlined_call_operand.hbm [shape: f32[1,1,128], index: 4, kind: output, shape index: {0}]   ;;  %s264_s5 = inlined_call_operand.hbm [shape: f32[1,1,128], index: 5, kind: output, shape index: {1}]  }
   0x1   :  { %v22_v0 = vld [vmem:[%s260_s1] sm:$0xff]  ;;  %144 = vset.pattern.permute.xlu0 %v203_v1 }
   0x2   :  { %12 = vsyncpa [#allocation5], 0  ;;  %37 = vperm.xlu0 %144, %v22_v0   ;;  %v34_v2 = vlaneseq  ;;  %v146_v3 = vld [vmem:[%s261_s2] ss:$0 sm:$0xff]  ;;  %vm47_vm0 = vcmask 31744   ;;  %vm72_vm2 = vcmp.ne.s32.totalorder %v22_v0, 2 }
   0x3   :  { %v21_v4 = vld [vmem:[%s259_s0] sm:$0xff]  ;;  %v204_v22 = vmov 0.0   ;;  %vm78_vm3 = vcmask 7168   ;;  %s205_s0 = smov [#allocation2]   ;;  %s110_s26 = sshll.u32 %s263_s4, 4  ;;  %s111_s26 = int_to_ptr.hbm [resolvable:$true] %s110_s26 }
   0x4   :  { %v35_v5 = vand.u32 127, %v34_v2  ;;  %v145_v6 = vld [vmem:[%s262_s3] ss:$0 sm:$0xff]  ;;  %v43_v7 = vsub.f32 %v21_v4, %v146_v3  ;;  %v135_v23 = vsel %vm72_vm2, 1.0, %v204_v22  ;;  %s108_s1 = sshll.u32 %s205_s0, 4  ;;  %s206_s27 = smov [#allocation4]   ;;  %s109_s1 = int_to_ptr.vmem [resolvable:$true] %s108_s1 }
   0x5   :  { %s119_s28 = sshll.u32 %s206_s27, 4  ;;  %s121_s6 = sshll.u32 %s264_s5, 4  ;;  %s120_s28 = int_to_ptr.vmem [resolvable:$true] %s119_s28  ;;  %s122_s6 = int_to_ptr.hbm [resolvable:$true] %s121_s6 }
  0x74   :  { %v38_v8 = vpop.permute.xlu0 %37 }
  0x75   :  { %vm39_vm1 = vcmp.eq.s32.totalorder %v35_v5, %v38_v8 }
  0x76   :  { %v68_v9 = vsel %vm39_vm1, %v145_v6, 0.0  ;;  %v44_v10 = vsel %vm39_vm1, %v43_v7, %v21_v4  ;;  %v46_v11 = vsel %vm39_vm1, %v43_v7, 0.0 }
  0x77   :  { %v69_v12 = vsel %vm47_vm0, %v68_v9, 0.0  ;;  %v45_v13 = vmul.f32 35.0, %v44_v10  ;;  %v48_v20 = vsel %vm47_vm0, %v46_v11, 0.0 }
  0x78   :  { %70 = vadd.xlane.f32.xlu2 %v69_v12 }
  0x79   :  { %v52_v14 = vsel %vm47_vm0, %v45_v13, -inf }
  0x7a   :  { %53 = vmax.xlane.f32.xlu0 %v52_v14 }
  0xeb   :  { %v71_v21 = vpop.xlane.xlu2 %70 }
  0xec   :  { %v76_v24 = vmul.f32 %v135_v23, %v71_v21 }
  0xed   :  { %v54_v15 = vpop.xlane.xlu0 %53 }
  0xee   :  { %v55_v16 = vsub.f32 %v45_v13, %v54_v15  ;;  %v89_v25 = vsel %vm78_vm3, %v76_v24, 0.0 }
  0xf0   :  { %v56_v17 = vmul.f32 1.442695, %v55_v16 }
  0xf2   :  { %147 = vpow2.f32 %v56_v17 }
  0xf8   :  { %v148_v18 = vpop.eup %147 }
  0xf9   :  { %v58_v19 = vsel %vm47_vm0, %v148_v18, 0.0 }
  0xfa   :  { %59 = vadd.xlane.f32.xlu1 %v58_v19 }
 0x102   :  { %49 = vadd.xlane.f32.xlu1 %v48_v20 }
 0x10a   :  { %90 = vadd.xlane.f32.xlu1 %v89_v25 }
 0x16d   :  { %v60_v26 = vpop.xlane.xlu1 %59 }
 0x16e   :  { %149 = vlog2.f32 %v60_v26 }
 0x174   :  { %v150_v27 = vpop.eup %149 }
 0x175   :  { %v62_v28 = vmul.f32 0.6931472, %v150_v27  ;;  %v50_v29 = vpop.xlane.xlu1 %49 }
 0x176   :  { %v51_v30 = vmul.f32 35.0, %v50_v29 }
 0x177   :  { %v63_v31 = vadd.f32 %v62_v28, %v54_v15 }
 0x179   :  { %v64_v32 = vsub.f32 %v63_v31, %v51_v30 }
 0x17b   :  { %v77_v33 = vmul.f32 %v76_v24, %v64_v32 }
 0x17d   :  { %v79_v34 = vsel %vm78_vm3, %v77_v33, 0.0  ;;  %v91_v35 = vpop.xlane.xlu1 %90 }
 0x17e   :  { %80 = vadd.xlane.f32.xlu2 %v79_v34  ;;  %v92_v36 = vrot.slane %v91_v35, 4 }
 0x180   :  { %v93_v37 = vadd.f32 %v92_v36, %v91_v35 }
 0x182   :  { %v94_v38 = vrot.slane %v93_v37, 2 }
 0x184   :  { %v95_v42 = vadd.f32 %v94_v38, %v93_v37 }
 0x186   :  { %v96_v45 = vrot.slane %v95_v42, 1 }
 0x188   :  { %v97_v48 = vadd.f32 %v96_v45, %v95_v42 }
 0x1f1   :  { %v81_v39 = vpop.xlane.xlu2 %80 }
 0x1f2   :  { %v82_v40 = vrot.slane %v81_v39, 4 }
 0x1f4   :  { %v83_v41 = vadd.f32 %v82_v40, %v81_v39 }
 0x1f6   :  { %v84_v43 = vrot.slane %v83_v41, 2 }
 0x1f8   :  { %v85_v44 = vadd.f32 %v84_v43, %v83_v41 }
 0x1fa   :  { %v86_v46 = vrot.slane %v85_v44, 1 }
 0x1fc   :  { %v87_v47 = vadd.f32 %v86_v46, %v85_v44 }
 0x1fe   :  { %136 = vpush %v87_v47 }
 0x1ff   :  { %138 = vpush %v97_v48 }
 0x22f   :  { %s137_s7 = spop %136 }
 0x230   :  { %v99_v49 = vstv %s137_s7  ;;  %s139_s8 = spop %138 }
 0x231   :  { %100 = vst [vmem:[#allocation2] sm:$0x1] %v99_v49  ;;  %v101_v50 = vstv %s139_s8 }
 0x232   :  { %102 = vst [vmem:[#allocation4] sm:$0x1] %v101_v50  ;;  %113 = dma.vmem_to_hbm [thread:$0]  %s109_s1, 16, %s111_s26, [#allocation3]  }
 0x233   :  { %124 = dma.vmem_to_hbm [thread:$0]  %s120_s28, 16, %s122_s6, [#allocation5]  }
 0x234   :  { %199 = dma.done.wait [#allocation3], 16  }
 0x235   :  { %200 = vsyncadd [#allocation3], 4294967280 }
 0x236   :  { %201 = dma.done.wait [#allocation5], 16  }
 0x237   :  { %202 = vsyncadd [#allocation5], 4294967280 }
 0x238   :  { %133 = vsyncpa [#allocation3], 1 }
 0x239   :  { %134 = vsyncpa [#allocation5], 1 }

</bundles_post_ra>
